<compile_context>
chip_gen: v6e
topology: v6e:2x2x1
jax: 0.10.0
libtpu: 0.0.40
codegen_flags: <defaults>
</compile_context>

<pallas_src>
import jax
import jax.numpy as jnp
from jax.experimental import pallas as pl
from jax.experimental.pallas import tpu as pltpu

_LANE = 128
_MAX_LANE_WIDTH = 32768           # cap on widened lane dim (elements)
_MAX_BLOCK_BYTES = 16 * 1024 * 1024
_MIN_BLOCK_BYTES = 2 * 1024 * 1024


# ----------------------------------------------------------------------------
# Path A (primary on-chip path): DMA-only HBM -> HBM copy, zero VMEM staging.
# ----------------------------------------------------------------------------
def _dma_copy_kernel(x_hbm_ref, o_hbm_ref, sem):
    cp = pltpu.make_async_copy(x_hbm_ref, o_hbm_ref, sem)
    cp.start()
    cp.wait()


def _identity_copy_dma(x):
    itemsize = jnp.dtype(x.dtype).itemsize
    return pl.pallas_call(
        _dma_copy_kernel,
        out_shape=jax.ShapeDtypeStruct(x.shape, x.dtype),
        in_specs=[pl.BlockSpec(memory_space=pl.ANY)],
        out_specs=pl.BlockSpec(memory_space=pl.ANY),
        scratch_shapes=[pltpu.SemaphoreType.DMA],
        cost_estimate=pl.CostEstimate(
            flops=0,
            transcendentals=0,
            bytes_accessed=2 * x.size * itemsize,
        ),
    )(x)


# ----------------------------------------------------------------------------
# Path B (secondary): BlockSpec-pipelined copy, generation-aware block sizing.
# ----------------------------------------------------------------------------
def _copy_kernel(x_ref, o_ref):
    # Pass-through: the abstract base pooler defines no transformation.
    o_ref[...] = x_ref[...]


def _vmem_capacity_bytes() -> int:
    try:
        return int(pltpu.get_tpu_info().vmem_capacity_bytes)
    except Exception:
        return 64 * 1024 * 1024  # conservative (v7x per-TC physical VMEM)


def _pick_block_bytes():
    """Generation-aware block size: in+out double-buffered -> ~4x block live."""
    vmem_cap = _vmem_capacity_bytes()
    budget = min(int(vmem_cap * 0.7), 96 * 1024 * 1024)   # keep headroom
    block = max(_MIN_BLOCK_BYTES, min(budget // 4, _MAX_BLOCK_BYTES))
    vmem_limit = min(vmem_cap, 4 * block + (8 * 1024 * 1024))
    return block, vmem_limit


def _pick_lane_width(n: int) -> int:
    """Largest multiple of 128 that divides n (capped) -> wide unmasked vst."""
    c = min(_MAX_LANE_WIDTH, n)
    c -= c % _LANE
    while c >= _LANE:
        if n % c == 0:
            return c
        c -= _LANE
    return _LANE


def _choose_row_tile(rows: int, cols: int, itemsize: int, block_bytes: int) -> int:
    """Largest sublane-aligned row tile whose block fits the byte budget."""
    bytes_per_row = max(1, cols * itemsize)
    tile = block_bytes // bytes_per_row
    tile = max(8, (tile // 8) * 8)  # sublane-aligned (multiple of 8)
    if tile >= rows:
        tile = rows  # full-extent escape hatch for the (8,128) rule
        # v7x megacore: give the "parallel" axis >= 2 grid steps when rows
        # allow it so both TensorCores can be fed. No-op on v5e/v6e (1 TC).
        if rows >= 16:
            half = ((rows // 2) // 8) * 8
            if half >= 8:
                tile = half
    return tile


def _identity_copy_pipelined(x2d):
    rows, cols = x2d.shape
    itemsize = jnp.dtype(x2d.dtype).itemsize
    block_bytes, vmem_limit = _pick_block_bytes()
    row_tile = _choose_row_tile(rows, cols, itemsize, block_bytes)
    grid = (pl.cdiv(rows, row_tile),)
    return pl.pallas_call(
        _copy_kernel,
        out_shape=jax.ShapeDtypeStruct((rows, cols), x2d.dtype),
        grid_spec=pltpu.PrefetchScalarGridSpec(
            num_scalar_prefetch=0,
            grid=grid,
            in_specs=[pl.BlockSpec((row_tile, cols), lambda i: (i, 0))],
            out_specs=pl.BlockSpec((row_tile, cols), lambda i: (i, 0)),
        ),
        cost_estimate=pl.CostEstimate(
            flops=0,
            transcendentals=0,
            bytes_accessed=2 * rows * cols * itemsize,
        ),
        compiler_params=pltpu.CompilerParams(
            dimension_semantics=("parallel",),
            vmem_limit_bytes=vmem_limit,
        ),
    )(x2d)


# ----------------------------------------------------------------------------
# Wrappers
# ----------------------------------------------------------------------------
def base_pooler_forward(encode_output):
    """Zero-cost path (recommended production path).

    The abstract base class defines no pooling math, so the identity needs no
    kernel launch / HBM traffic at all.
    """
    return {"pooler_output": encode_output["last_hidden_state"]}


def base_pooler_forward_pallas(encode_output):
    """Pallas 'forward' for BasePooler via a single HBM->HBM async DMA.

    Args:
      encode_output: dict with key "last_hidden_state" of shape [B, S, H].
    Returns:
      dict with key "pooler_output" (identity of the input hidden states).
    """
    x = encode_output["last_hidden_state"]
    return {"pooler_output": _identity_copy_dma(x)}


def base_pooler_forward_pallas_pipelined(encode_output):
    """Pallas 'forward' via a tuned BlockSpec-pipelined VMEM copy.

    Kept for cases where a grid-pipelined kernel is required (e.g. as a
    template for a concrete pooler subclass that adds real math per tile).
    """
    x = encode_output["last_hidden_state"]
    b, s, h = x.shape
    n = b * s * h
    itemsize = jnp.dtype(x.dtype).itemsize

    # Pad the flattened length up to a multiple of 128 so the output slab is
    # always lane-dense (unmasked full-lane stores), then slice the pad off.
    pad = (-n) % _LANE
    flat = x.reshape(-1)
    if pad:
        flat = jnp.concatenate([flat, jnp.zeros((pad,), dtype=x.dtype)])
    n_padded = n + pad

    lane_w = _pick_lane_width(n_padded)
    x2d = flat.reshape(n_padded // lane_w, lane_w)

    out2d = _identity_copy_pipelined(x2d)
    out = out2d.reshape(-1)[:n].reshape(b, s, h)
    del itemsize
    return {"pooler_output": out}


if __name__ == "__main__":
    key = jax.random.PRNGKey(0)
    batch, seq, hidden = 2, 8, 32
    x = jax.random.normal(key, (batch, seq, hidden), dtype=jnp.float32)

    encode_output = {"last_hidden_state": x}

    # Primary Pallas path: DMA-only HBM->HBM copy.
    out_dma = jax.block_until_ready(
        base_pooler_forward_pallas(encode_output)["pooler_output"]
    )

    # Secondary Pallas path: tuned BlockSpec-pipelined copy.
    out_pipe = jax.block_until_ready(
        base_pooler_forward_pallas_pipelined(encode_output)["pooler_output"]
    )

    # Zero-cost reference path (the recommended production path).
    ref = base_pooler_forward(encode_output)["pooler_output"]

    # Sanity checks: identity semantics (no transformation in the base class).
    assert out_dma.shape == x.shape and out_dma.dtype == x.dtype
    assert out_pipe.shape == x.shape and out_pipe.dtype == x.dtype
    assert jnp.array_equal(out_dma, ref)
    assert jnp.array_equal(out_pipe, ref)
    assert jnp.array_equal(out_dma, x)

    print("KERNEL_OK")
</pallas_src>

<mosaic_0001>
module attributes {stable_mosaic.version = 11 : i64} {
  func.func @_dma_copy_kernel(%arg0: memref<2x8x32xf32, #tpu.memory_space<any>>, %arg1: memref<2x8x32xf32, #tpu.memory_space<any>>, %arg2: memref<!tpu.dma_semaphore, #tpu.memory_space<semaphore_mem>>) attributes {dimension_semantics = [], scalar_prefetch = 0 : i64, scratch_operands = 1 : i64, tpu.core_type = #tpu.core_type<tc>} {
    tpu.enqueue_dma source(%arg0 : memref<2x8x32xf32, #tpu.memory_space<any>>) target(%arg1 : memref<2x8x32xf32, #tpu.memory_space<any>>) target_semaphore(%arg2 : memref<!tpu.dma_semaphore, #tpu.memory_space<semaphore_mem>>)
    tpu.wait_dma2 semaphore(%arg2 : memref<!tpu.dma_semaphore, #tpu.memory_space<semaphore_mem>>) src(%arg0 : memref<2x8x32xf32, #tpu.memory_space<any>>) dst(%arg1 : memref<2x8x32xf32, #tpu.memory_space<any>>)
    return
  }
}

</mosaic_0001>

<bundles_post_ra>
// kernel: tpu_custom_call.1
= control target key start
LH: loop header
LB: loop body
LE: loop exit
PB: predicated region body
PF: predicated region fallthrough
CT: control target
= control target key end

     0   :  { %s29_s6 = smov [#allocation2]   ;;  %s30_s7 = smov 131072   ;;  %s48_s0 = inlined_call_operand.hbm [shape: f32[2,8,32], index: 0, kind: input, shape index: {}]   ;;  %s49_s1 = inlined_call_operand.hbm [shape: f32[2,8,32], index: 1, kind: output, shape index: {}]  }
   0x1   :  { %s31_s8 = smov 0  }
   0x2   :  { %12 = dma.general %s48_s0, 256, %s49_s1, %s29_s6, %s30_s7, [#allocation4], %s31_s8, 0  }
   0x3   :  { %27 = dma.done.wait [#allocation2], 256 }
   0x4   :  { %28 = vsyncadd [#allocation2], 4294967040 }
   0x5   :  { %17 = vsyncmov [#allocation2] }
   0x8   :  { %s18_s13 = vpop.sfrf %17 }
   0x9   :  { %p23_p0 = scmp.ne.s32.totalorder %s18_s13, 0 }
   0xb   :  { %22 = shalt.err (%p23_p0)  }

</bundles_post_ra>
